<compile_context>
chip_gen: v7x
topology: tpu7x:2x2x1
jax: 0.10.0
libtpu: 0.0.40
codegen_flags: <defaults>
</compile_context>

<pallas_src>
import math

import jax
import jax.numpy as jnp
from jax.experimental import pallas as pl
from jax.experimental.pallas import tpu as pltpu

_OUT_PAD = 128  # lane-dense padded width of the final projection output


def _round_up(x, m):
    return (x + m - 1) // m * m


def _cdiv(a, b):
    return (a + b - 1) // b


def _decoder_kernel(r_ref, z_ref, m_ref, tx_ref,
                    w0r_ref, w0z_ref, w0m_ref, w0t_ref, b0_ref,
                    w1_ref, b1_ref,
                    w2_ref, b2_ref,
                    wf_ref, bf_ref,
                    y_ref):
    f32 = jnp.float32

    # Layer 0 over cat([r, z, m, target_projection(tx)]) without materializing
    # the concat: the weight is split into row blocks, and the rank-1 target
    # projection has been folded into (w0t_ref, b0_ref) at trace time, so it
    # is a pure VPU broadcast multiply-add (no short-K matmul on the MXU).
    h = jnp.dot(r_ref[...], w0r_ref[...], preferred_element_type=f32)
    h = h + jnp.dot(z_ref[...], w0z_ref[...], preferred_element_type=f32)
    h = h + jnp.dot(m_ref[...], w0m_ref[...], preferred_element_type=f32)
    h = h + tx_ref[...].astype(f32) * w0t_ref[...].astype(f32)
    h = jnp.maximum(h + b0_ref[...].astype(f32), 0.0)

    # Layers 1 & 2 (ReLU-linears), f32 accumulation on the MXU.
    h = jnp.dot(h.astype(w1_ref.dtype), w1_ref[...], preferred_element_type=f32)
    h = jnp.maximum(h + b1_ref[...].astype(f32), 0.0)
    h = jnp.dot(h.astype(w2_ref.dtype), w2_ref[...], preferred_element_type=f32)
    h = jnp.maximum(h + b2_ref[...].astype(f32), 0.0)

    # Final projection, padded to _OUT_PAD lanes -> lane-dense full-width store.
    y = jnp.dot(h.astype(wf_ref.dtype), wf_ref[...], preferred_element_type=f32)
    y = y + bf_ref[...].astype(f32)
    y_ref[...] = y.astype(y_ref.dtype)


def _rep_spec(shape):
    """BlockSpec for a grid-invariant (resident) operand; single-buffered."""
    idx = lambda i: (0, 0)
    try:
        return pl.BlockSpec(shape, idx, pipeline_mode=pl.Buffered(1))
    except (AttributeError, TypeError):
        return pl.BlockSpec(shape, idx)


def _vmem_bytes(tm, H, H4, itemsize):
    """Approximate per-step VMEM footprint (lane/sublane padded)."""
    def tile(r, c, bufs):
        return _round_up(r, 8) * _round_up(c, 128) * itemsize * bufs
    b = 0
    b += 3 * tile(tm, H, 2) + tile(tm, 1, 2)            # r, z, m, tx (dbl-buf)
    b += 3 * tile(H, H4, 1) + 2 * tile(1, H4, 1)        # w0 blocks + w0t_eff, b0
    b += 2 * (tile(H4, H4, 1) + tile(1, H4, 1))         # w1, b1, w2, b2
    b += tile(H4, _OUT_PAD, 1) + tile(1, _OUT_PAD, 1)   # wf, bf
    b += tile(tm, _OUT_PAD, 2)                          # output (dbl-buf)
    b += 4 * tile(tm, H4, 1)                            # intermediate headroom
    return b


def decoder_forward(m, r, z, target_x, params, *, block_rows=512):
    """Pallas equivalent of Decoder.forward.

    m, r, z: (B, T, H); target_x: (B, T, 1).
    params store weights as (in_dim, out_dim) (i.e. already W.T of nn.Linear).
    Returns y_pred: (B, T, 2).
    """
    B, T, H = m.shape
    H4 = 4 * H
    N = B * T
    out_dim = params["wf"].shape[-1]
    assert out_dim <= _OUT_PAD, "final projection wider than padded store"

    # Keep the (tm, 4H) f32 working set reasonable for large hidden sizes,
    # while amortizing per-step pipeline overhead for small H.
    if H4 >= 512:
        block_rows = min(block_rows, 256)
    # Keep at least 2 grid steps so the 'parallel' axis can feed both v7x TCs.
    tm = max(8, min(block_rows, _round_up(_cdiv(N, 2), 8)))
    grid = (_cdiv(N, tm),)  # ragged last block; OOB output rows are dropped

    def flat(x):
        return x.reshape(N, x.shape[-1])  # free reshape, no pad copies

    r2, z2, m2, tx2 = flat(r), flat(z), flat(m), flat(target_x)

    # Split the layer-0 weight into the concat blocks [r | z | m | tx] and
    # fold the rank-1 target projection into the tx block / bias.
    w0 = params["w0"]
    w0r, w0z, w0m, w0t = w0[0:H], w0[H:2 * H], w0[2 * H:3 * H], w0[3 * H:4 * H]
    w0t_eff = jnp.matmul(params["wtp"], w0t)                   # (1, 4H)
    b0_eff = params["b0"] + jnp.matmul(params["btp"], w0t)     # (1, 4H)

    # Pad the final projection to a lane-dense width (out_dim -> 128).
    wf, bf = params["wf"], params["bf"]
    wf_pad = jnp.zeros((H4, _OUT_PAD), wf.dtype).at[:, :out_dim].set(wf)
    bf_pad = jnp.zeros((1, _OUT_PAD), bf.dtype).at[:, :out_dim].set(bf)

    row_spec = lambda width: pl.BlockSpec((tm, width), lambda i: (i, 0))

    in_specs = [
        row_spec(H), row_spec(H), row_spec(H), row_spec(1),     # r, z, m, tx
        _rep_spec((H, H4)), _rep_spec((H, H4)), _rep_spec((H, H4)),  # w0 r/z/m
        _rep_spec((1, H4)), _rep_spec((1, H4)),                 # w0t_eff, b0
        _rep_spec((H4, H4)), _rep_spec((1, H4)),                # w1, b1
        _rep_spec((H4, H4)), _rep_spec((1, H4)),                # w2, b2
        _rep_spec((H4, _OUT_PAD)), _rep_spec((1, _OUT_PAD)),    # wf, bf
    ]
    out_spec = pl.BlockSpec((tm, _OUT_PAD), lambda i: (i, 0))

    itemsize = jnp.dtype(m.dtype).itemsize
    flops = 2 * N * H4 * (3 * H + 2 * H4 + _OUT_PAD)
    bytes_accessed = itemsize * (
        N * (3 * H + 1 + _OUT_PAD)                                # activations
        + 3 * H * H4 + 4 * H4 + 2 * H4 * H4                       # layer 0-2 params
        + H4 * _OUT_PAD + _OUT_PAD)                               # final proj

    # Explicit scoped-VMEM limit sized to the real footprint, clamped under
    # physical VMEM (64 MiB on v7x, 128 MiB on v5e/v6e).
    try:
        phys_vmem = int(pltpu.get_tpu_info().vmem_capacity_bytes)
    except Exception:  # conservative fallback
        phys_vmem = 64 << 20
    vmem_limit = max(32 << 20,
                     min(int(phys_vmem * 0.9),
                         2 * _vmem_bytes(tm, H, H4, itemsize)))

    y_pad = pl.pallas_call(
        _decoder_kernel,
        out_shape=jax.ShapeDtypeStruct((N, _OUT_PAD), m.dtype),
        grid_spec=pl.GridSpec(grid=grid, in_specs=in_specs, out_specs=out_spec),
        compiler_params=pltpu.CompilerParams(
            dimension_semantics=("parallel",),
            vmem_limit_bytes=vmem_limit),
        cost_estimate=pl.CostEstimate(
            flops=flops, transcendentals=0, bytes_accessed=bytes_accessed),
    )(
        r2, z2, m2, tx2,
        w0r, w0z, w0m, w0t_eff, b0_eff,
        params["w1"], params["b1"],
        params["w2"], params["b2"],
        wf_pad, bf_pad,
    )

    return y_pad[:, :out_dim].reshape(B, T, out_dim)


def _reference(m, r, z, target_x, params):
    hp = jax.lax.Precision.HIGHEST
    tx = jnp.matmul(target_x, params["wtp"], precision=hp) + params["btp"]
    hidden = jnp.concatenate([r, z, m, tx], axis=-1)
    hidden = jax.nn.relu(jnp.matmul(hidden, params["w0"], precision=hp) + params["b0"])
    hidden = jax.nn.relu(jnp.matmul(hidden, params["w1"], precision=hp) + params["b1"])
    hidden = jax.nn.relu(jnp.matmul(hidden, params["w2"], precision=hp) + params["b2"])
    return jnp.matmul(hidden, params["wf"], precision=hp) + params["bf"]


def _xavier_uniform(key, shape, gain=1.0):
    fan_in, fan_out = shape
    a = gain * math.sqrt(6.0 / (fan_in + fan_out))
    return jax.random.uniform(key, shape, jnp.float32, -a, a)


if __name__ == "__main__":
    B, T, H = 2, 8, 32          # batch=2, num_targets=8, num_hidden=32
    H4 = 4 * H

    keys = jax.random.split(jax.random.PRNGKey(0), 16)

    m = jax.random.normal(keys[0], (B, T, H), jnp.float32)
    r = jax.random.normal(keys[1], (B, T, H), jnp.float32)
    z = jax.random.normal(keys[2], (B, T, H), jnp.float32)
    target_x = jax.random.normal(keys[3], (B, T, 1), jnp.float32)

    relu_gain = math.sqrt(2.0)
    params = {
        "wtp": _xavier_uniform(keys[4], (1, H)),
        "btp": jax.random.uniform(keys[5], (1, H), jnp.float32, -0.5, 0.5),
        "w0": _xavier_uniform(keys[6], (H4, H4), relu_gain),
        "b0": jax.random.uniform(keys[7], (1, H4), jnp.float32, -0.1, 0.1),
        "w1": _xavier_uniform(keys[8], (H4, H4), relu_gain),
        "b1": jax.random.uniform(keys[9], (1, H4), jnp.float32, -0.1, 0.1),
        "w2": _xavier_uniform(keys[10], (H4, H4), relu_gain),
        "b2": jax.random.uniform(keys[11], (1, H4), jnp.float32, -0.1, 0.1),
        "wf": _xavier_uniform(keys[12], (H4, 2)),
        "bf": jax.random.uniform(keys[13], (1, 2), jnp.float32, -0.1, 0.1),
    }

    y = decoder_forward(m, r, z, target_x, params)
    y = jax.block_until_ready(y)

    y_ref = _reference(m, r, z, target_x, params)
    assert y.shape == (B, T, 2)
    assert jnp.allclose(y, y_ref, atol=2e-4, rtol=2e-4), float(
        jnp.max(jnp.abs(y - y_ref)))

    print("KERNEL_OK")
</pallas_src>

<mosaic_0001>
module attributes {stable_mosaic.version = 11 : i64} {
  func.func @_decoder_kernel(%arg0: i32, %arg1: memref<8x32xf32, #tpu.memory_space<vmem>>, %arg2: memref<8x32xf32, #tpu.memory_space<vmem>>, %arg3: memref<8x32xf32, #tpu.memory_space<vmem>>, %arg4: memref<8x1xf32, #tpu.memory_space<vmem>>, %arg5: memref<32x128xf32, #tpu.memory_space<vmem>>, %arg6: memref<32x128xf32, #tpu.memory_space<vmem>>, %arg7: memref<32x128xf32, #tpu.memory_space<vmem>>, %arg8: memref<1x128xf32, #tpu.memory_space<vmem>>, %arg9: memref<1x128xf32, #tpu.memory_space<vmem>>, %arg10: memref<128x128xf32, #tpu.memory_space<vmem>>, %arg11: memref<1x128xf32, #tpu.memory_space<vmem>>, %arg12: memref<128x128xf32, #tpu.memory_space<vmem>>, %arg13: memref<1x128xf32, #tpu.memory_space<vmem>>, %arg14: memref<128x128xf32, #tpu.memory_space<vmem>>, %arg15: memref<1x128xf32, #tpu.memory_space<vmem>>, %arg16: memref<8x128xf32, #tpu.memory_space<vmem>>) attributes {dimension_semantics = [#tpu.dimension_semantics<parallel>], iteration_bounds = array<i64: 2>, scalar_prefetch = 0 : i64, scratch_operands = 0 : i64, tpu.core_type = #tpu.core_type<tc>, window_params = [{transform_indices = @transform_0, window_bounds = array<i64: 8, 32>}, {transform_indices = @transform_1, window_bounds = array<i64: 8, 32>}, {transform_indices = @transform_2, window_bounds = array<i64: 8, 32>}, {transform_indices = @transform_3, window_bounds = array<i64: 8, 1>}, {pipeline_mode = #tpu.pipeline_mode<synchronous>, transform_indices = @transform_4, window_bounds = array<i64: 32, 128>}, {pipeline_mode = #tpu.pipeline_mode<synchronous>, transform_indices = @transform_5, window_bounds = array<i64: 32, 128>}, {pipeline_mode = #tpu.pipeline_mode<synchronous>, transform_indices = @transform_6, window_bounds = array<i64: 32, 128>}, {pipeline_mode = #tpu.pipeline_mode<synchronous>, transform_indices = @transform_7, window_bounds = array<i64: 1, 128>}, {pipeline_mode = #tpu.pipeline_mode<synchronous>, transform_indices = @transform_8, window_bounds = array<i64: 1, 128>}, {pipeline_mode = #tpu.pipeline_mode<synchronous>, transform_indices = @transform_9, window_bounds = array<i64: 128, 128>}, {pipeline_mode = #tpu.pipeline_mode<synchronous>, transform_indices = @transform_10, window_bounds = array<i64: 1, 128>}, {pipeline_mode = #tpu.pipeline_mode<synchronous>, transform_indices = @transform_11, window_bounds = array<i64: 128, 128>}, {pipeline_mode = #tpu.pipeline_mode<synchronous>, transform_indices = @transform_12, window_bounds = array<i64: 1, 128>}, {pipeline_mode = #tpu.pipeline_mode<synchronous>, transform_indices = @transform_13, window_bounds = array<i64: 128, 128>}, {pipeline_mode = #tpu.pipeline_mode<synchronous>, transform_indices = @transform_14, window_bounds = array<i64: 1, 128>}, {transform_indices = @transform_15, window_bounds = array<i64: 8, 128>}]} {
    %c0 = arith.constant 0 : index
    %c0_0 = arith.constant 0 : index
    %0 = vector.load %arg1[%c0, %c0_0] : memref<8x32xf32, #tpu.memory_space<vmem>>, vector<8x32xf32>
    %c0_1 = arith.constant 0 : index
    %c0_2 = arith.constant 0 : index
    %1 = vector.load %arg5[%c0_1, %c0_2] : memref<32x128xf32, #tpu.memory_space<vmem>>, vector<32x128xf32>
    %cst = arith.constant dense<0.000000e+00> : vector<8x128xf32>
    %2 = tpu.matmul %0, %1, %cst {dimension_numbers = #tpu.dot_dimension_numbers<[1], [0], [0], [1], [0, 0, 1, 1], [], []>} : vector<8x32xf32>, vector<32x128xf32>, vector<8x128xf32> -> vector<8x128xf32>
    %c0_3 = arith.constant 0 : index
    %c0_4 = arith.constant 0 : index
    %3 = vector.load %arg2[%c0_3, %c0_4] : memref<8x32xf32, #tpu.memory_space<vmem>>, vector<8x32xf32>
    %c0_5 = arith.constant 0 : index
    %c0_6 = arith.constant 0 : index
    %4 = vector.load %arg6[%c0_5, %c0_6] : memref<32x128xf32, #tpu.memory_space<vmem>>, vector<32x128xf32>
    %cst_7 = arith.constant dense<0.000000e+00> : vector<8x128xf32>
    %5 = tpu.matmul %3, %4, %cst_7 {dimension_numbers = #tpu.dot_dimension_numbers<[1], [0], [0], [1], [0, 0, 1, 1], [], []>} : vector<8x32xf32>, vector<32x128xf32>, vector<8x128xf32> -> vector<8x128xf32>
    %6 = arith.addf %2, %5 : vector<8x128xf32>
    %c0_8 = arith.constant 0 : index
    %c0_9 = arith.constant 0 : index
    %7 = vector.load %arg3[%c0_8, %c0_9] : memref<8x32xf32, #tpu.memory_space<vmem>>, vector<8x32xf32>
    %c0_10 = arith.constant 0 : index
    %c0_11 = arith.constant 0 : index
    %8 = vector.load %arg7[%c0_10, %c0_11] : memref<32x128xf32, #tpu.memory_space<vmem>>, vector<32x128xf32>
    %cst_12 = arith.constant dense<0.000000e+00> : vector<8x128xf32>
    %9 = tpu.matmul %7, %8, %cst_12 {dimension_numbers = #tpu.dot_dimension_numbers<[1], [0], [0], [1], [0, 0, 1, 1], [], []>} : vector<8x32xf32>, vector<32x128xf32>, vector<8x128xf32> -> vector<8x128xf32>
    %10 = arith.addf %6, %9 : vector<8x128xf32>
    %c0_13 = arith.constant 0 : index
    %c0_14 = arith.constant 0 : index
    %11 = vector.load %arg4[%c0_13, %c0_14] : memref<8x1xf32, #tpu.memory_space<vmem>>, vector<8x1xf32>
    %c0_15 = arith.constant 0 : index
    %c0_16 = arith.constant 0 : index
    %12 = vector.load %arg8[%c0_15, %c0_16] : memref<1x128xf32, #tpu.memory_space<vmem>>, vector<1x128xf32>
    %13 = vector.broadcast %11 : vector<8x1xf32> to vector<8x128xf32>
    %14 = vector.broadcast %12 : vector<1x128xf32> to vector<8x128xf32>
    %15 = arith.mulf %13, %14 : vector<8x128xf32>
    %16 = arith.addf %10, %15 : vector<8x128xf32>
    %c0_17 = arith.constant 0 : index
    %c0_18 = arith.constant 0 : index
    %17 = vector.load %arg9[%c0_17, %c0_18] : memref<1x128xf32, #tpu.memory_space<vmem>>, vector<1x128xf32>
    %18 = vector.broadcast %17 : vector<1x128xf32> to vector<8x128xf32>
    %19 = arith.addf %16, %18 : vector<8x128xf32>
    %cst_19 = arith.constant 0.000000e+00 : f32
    %20 = vector.broadcast %cst_19 : f32 to vector<8x128xf32>
    %21 = arith.maximumf %19, %20 : vector<8x128xf32>
    %c0_20 = arith.constant 0 : index
    %c0_21 = arith.constant 0 : index
    %22 = vector.load %arg10[%c0_20, %c0_21] : memref<128x128xf32, #tpu.memory_space<vmem>>, vector<128x128xf32>
    %cst_22 = arith.constant dense<0.000000e+00> : vector<8x128xf32>
    %23 = tpu.matmul %21, %22, %cst_22 {dimension_numbers = #tpu.dot_dimension_numbers<[1], [0], [0], [1], [0, 0, 1, 1], [], []>} : vector<8x128xf32>, vector<128x128xf32>, vector<8x128xf32> -> vector<8x128xf32>
    %c0_23 = arith.constant 0 : index
    %c0_24 = arith.constant 0 : index
    %24 = vector.load %arg11[%c0_23, %c0_24] : memref<1x128xf32, #tpu.memory_space<vmem>>, vector<1x128xf32>
    %25 = vector.broadcast %24 : vector<1x128xf32> to vector<8x128xf32>
    %26 = arith.addf %23, %25 : vector<8x128xf32>
    %cst_25 = arith.constant 0.000000e+00 : f32
    %27 = vector.broadcast %cst_25 : f32 to vector<8x128xf32>
    %28 = arith.maximumf %26, %27 : vector<8x128xf32>
    %c0_26 = arith.constant 0 : index
    %c0_27 = arith.constant 0 : index
    %29 = vector.load %arg12[%c0_26, %c0_27] : memref<128x128xf32, #tpu.memory_space<vmem>>, vector<128x128xf32>
    %cst_28 = arith.constant dense<0.000000e+00> : vector<8x128xf32>
    %30 = tpu.matmul %28, %29, %cst_28 {dimension_numbers = #tpu.dot_dimension_numbers<[1], [0], [0], [1], [0, 0, 1, 1], [], []>} : vector<8x128xf32>, vector<128x128xf32>, vector<8x128xf32> -> vector<8x128xf32>
    %c0_29 = arith.constant 0 : index
    %c0_30 = arith.constant 0 : index
    %31 = vector.load %arg13[%c0_29, %c0_30] : memref<1x128xf32, #tpu.memory_space<vmem>>, vector<1x128xf32>
    %32 = vector.broadcast %31 : vector<1x128xf32> to vector<8x128xf32>
    %33 = arith.addf %30, %32 : vector<8x128xf32>
    %cst_31 = arith.constant 0.000000e+00 : f32
    %34 = vector.broadcast %cst_31 : f32 to vector<8x128xf32>
    %35 = arith.maximumf %33, %34 : vector<8x128xf32>
    %c0_32 = arith.constant 0 : index
    %c0_33 = arith.constant 0 : index
    %36 = vector.load %arg14[%c0_32, %c0_33] : memref<128x128xf32, #tpu.memory_space<vmem>>, vector<128x128xf32>
    %cst_34 = arith.constant dense<0.000000e+00> : vector<8x128xf32>
    %37 = tpu.matmul %35, %36, %cst_34 {dimension_numbers = #tpu.dot_dimension_numbers<[1], [0], [0], [1], [0, 0, 1, 1], [], []>} : vector<8x128xf32>, vector<128x128xf32>, vector<8x128xf32> -> vector<8x128xf32>
    %c0_35 = arith.constant 0 : index
    %c0_36 = arith.constant 0 : index
    %38 = vector.load %arg15[%c0_35, %c0_36] : memref<1x128xf32, #tpu.memory_space<vmem>>, vector<1x128xf32>
    %39 = vector.broadcast %38 : vector<1x128xf32> to vector<8x128xf32>
    %40 = arith.addf %37, %39 : vector<8x128xf32>
    %c0_37 = arith.constant 0 : index
    %c0_38 = arith.constant 0 : index
    %41 = vector.load %arg16[%c0_37, %c0_38] : memref<8x128xf32, #tpu.memory_space<vmem>>, vector<8x128xf32>
    tpu.vector_store %arg16[%c0_37, %c0_38], %40 {strides = array<i32>} : memref<8x128xf32, #tpu.memory_space<vmem>>, vector<8x128xf32>,
    return
  }
  func.func @transform_0(%arg0: i32) -> (i32, i32) {
    %c0_i32 = arith.constant 0 : i32
    %c0_i32_0 = arith.constant 0 : i32
    return %arg0, %c0_i32 : i32, i32
  }
  func.func @transform_1(%arg0: i32) -> (i32, i32) {
    %c0_i32 = arith.constant 0 : i32
    %c0_i32_0 = arith.constant 0 : i32
    return %arg0, %c0_i32 : i32, i32
  }
  func.func @transform_2(%arg0: i32) -> (i32, i32) {
    %c0_i32 = arith.constant 0 : i32
    %c0_i32_0 = arith.constant 0 : i32
    return %arg0, %c0_i32 : i32, i32
  }
  func.func @transform_3(%arg0: i32) -> (i32, i32) {
    %c0_i32 = arith.constant 0 : i32
    %c0_i32_0 = arith.constant 0 : i32
    return %arg0, %c0_i32 : i32, i32
  }
  func.func @transform_4(%arg0: i32) -> (i32, i32) {
    %c0_i32 = arith.constant 0 : i32
    %c0_i32_0 = arith.constant 0 : i32
    %c0_i32_1 = arith.constant 0 : i32
    return %c0_i32, %c0_i32_0 : i32, i32
  }
  func.func @transform_5(%arg0: i32) -> (i32, i32) {
    %c0_i32 = arith.constant 0 : i32
    %c0_i32_0 = arith.constant 0 : i32
    %c0_i32_1 = arith.constant 0 : i32
    return %c0_i32, %c0_i32_0 : i32, i32
  }
  func.func @transform_6(%arg0: i32) -> (i32, i32) {
    %c0_i32 = arith.constant 0 : i32
    %c0_i32_0 = arith.constant 0 : i32
    %c0_i32_1 = arith.constant 0 : i32
    return %c0_i32, %c0_i32_0 : i32, i32
  }
  func.func @transform_7(%arg0: i32) -> (i32, i32) {
    %c0_i32 = arith.constant 0 : i32
    %c0_i32_0 = arith.constant 0 : i32
    %c0_i32_1 = arith.constant 0 : i32
    return %c0_i32, %c0_i32_0 : i32, i32
  }
  func.func @transform_8(%arg0: i32) -> (i32, i32) {
    %c0_i32 = arith.constant 0 : i32
    %c0_i32_0 = arith.constant 0 : i32
    %c0_i32_1 = arith.constant 0 : i32
    return %c0_i32, %c0_i32_0 : i32, i32
  }
  func.func @transform_9(%arg0: i32) -> (i32, i32) {
    %c0_i32 = arith.constant 0 : i32
    %c0_i32_0 = arith.constant 0 : i32
    %c0_i32_1 = arith.constant 0 : i32
    return %c0_i32, %c0_i32_0 : i32, i32
  }
  func.func @transform_10(%arg0: i32) -> (i32, i32) {
    %c0_i32 = arith.constant 0 : i32
    %c0_i32_0 = arith.constant 0 : i32
    %c0_i32_1 = arith.constant 0 : i32
    return %c0_i32, %c0_i32_0 : i32, i32
  }
  func.func @transform_11(%arg0: i32) -> (i32, i32) {
    %c0_i32 = arith.constant 0 : i32
    %c0_i32_0 = arith.constant 0 : i32
    %c0_i32_1 = arith.constant 0 : i32
    return %c0_i32, %c0_i32_0 : i32, i32
  }
  func.func @transform_12(%arg0: i32) -> (i32, i32) {
    %c0_i32 = arith.constant 0 : i32
    %c0_i32_0 = arith.constant 0 : i32
    %c0_i32_1 = arith.constant 0 : i32
    return %c0_i32, %c0_i32_0 : i32, i32
  }
  func.func @transform_13(%arg0: i32) -> (i32, i32) {
    %c0_i32 = arith.constant 0 : i32
    %c0_i32_0 = arith.constant 0 : i32
    %c0_i32_1 = arith.constant 0 : i32
    return %c0_i32, %c0_i32_0 : i32, i32
  }
  func.func @transform_14(%arg0: i32) -> (i32, i32) {
    %c0_i32 = arith.constant 0 : i32
    %c0_i32_0 = arith.constant 0 : i32
    %c0_i32_1 = arith.constant 0 : i32
    return %c0_i32, %c0_i32_0 : i32, i32
  }
  func.func @transform_15(%arg0: i32) -> (i32, i32) {
    %c0_i32 = arith.constant 0 : i32
    %c0_i32_0 = arith.constant 0 : i32
    return %arg0, %c0_i32 : i32, i32
  }
}

</mosaic_0001>

<bundles_post_ra>
// kernel: tpu_custom_call.1
= control target key start
LH: loop header
LB: loop body
LE: loop exit
PB: predicated region body
PF: predicated region fallthrough
CT: control target
= control target key end

     0   :  { %s2726_s0 = inlined_call_operand.hbm [shape: f32[16,32], index: 0, kind: input, shape index: {}]   ;;  %s2727_s1 = inlined_call_operand.hbm [shape: f32[16,32], index: 1, kind: input, shape index: {}]   ;;  %s2728_s2 = inlined_call_operand.hbm [shape: f32[16,32], index: 2, kind: input, shape index: {}]   ;;  %s2729_s3 = inlined_call_operand.vmem [shape: f32[16,1], index: 3, kind: input, shape index: {}]   ;;  %s2730_s4 = inlined_call_operand.vmem [shape: f32[32,128], index: 4, kind: input, shape index: {}]   ;;  %s2731_s5 = inlined_call_operand.hbm [shape: f32[32,128], index: 5, kind: input, shape index: {}]   ;;  %s2732_s6 = inlined_call_operand.hbm [shape: f32[32,128], index: 6, kind: input, shape index: {}]   ;;  %s2733_s7 = inlined_call_operand.vmem [shape: f32[1,128], index: 7, kind: input, shape index: {}]   ;;  %s2734_s8 = inlined_call_operand.vmem [shape: f32[1,128], index: 8, kind: input, shape index: {}]   ;;  %s2735_s9 = inlined_call_operand.hbm [shape: f32[128,128], index: 9, kind: input, shape index: {}]   ;;  %s2736_s10 = inlined_call_operand.vmem [shape: f32[1,128], index: 10, kind: input, shape index: {}]   ;;  %s2737_s11 = inlined_call_operand.hbm [shape: f32[128,128], index: 11, kind: input, shape index: {}]   ;;  %s2738_s12 = inlined_call_operand.vmem [shape: f32[1,128], index: 12, kind: input, shape index: {}]   ;;  %s2739_s13 = inlined_call_operand.hbm [shape: f32[128,128], index: 13, kind: input, shape index: {}]   ;;  %s2740_s14 = inlined_call_operand.vmem [shape: f32[1,128], index: 14, kind: input, shape index: {}]   ;;  %s2741_s15 = inlined_call_operand.hbm [shape: f32[16,128], index: 15, kind: output, shape index: {}]  }
   0x1   :  { %2770 = sst [smem:[#allocation30_spill]] %s2727_s1 }
   0x2   :  { %2771 = sst [smem:[#allocation31_spill]] %s2729_s3 }
   0x3   :  { %2772 = sst [smem:[#allocation32_spill]] %s2730_s4 }
   0x4   :  { %2773 = sst [smem:[#allocation33_spill]] %s2731_s5 }
   0x5   :  { %2774 = sst [smem:[#allocation34_spill]] %s2733_s7 }
   0x6   :  { %2775 = sst [smem:[#allocation35_spill]] %s2734_s8 }
   0x7   :  { %2776 = sst [smem:[#allocation36_spill]] %s2735_s9 }
   0x8   :  { %2777 = sst [smem:[#allocation37_spill]] %s2736_s10 }
   0x9   :  { %2778 = sst [smem:[#allocation38_spill]] %s2738_s12 }
   0xa   :  { %2779 = sst [smem:[#allocation39_spill]] %s2740_s14 }
   0xb   :  { %2780 = sst [smem:[#allocation40_spill]] %s2741_s15 }
   0xc   :  { %20 = vsyncpa [#allocation3], 0 }
   0xd   :  { %22 = vsyncpa [#allocation3 + $0x1], 0 }
   0xe   :  { %23 = vsyncpa [#allocation6], 0 }
   0xf   :  { %25 = vsyncpa [#allocation6 + $0x1], 0 }
  0x10   :  { %26 = vsyncpa [#allocation9], 0 }
  0x11   :  { %27 = vsyncpa [#allocation12], 0 }
  0x12   :  { %28 = vsyncpa [#allocation15], 0 }
  0x13   :  { %29 = vsyncpa [#allocation4], 0 }
  0x14   :  { %31 = vsyncpa [#allocation4 + $0x1], 0  ;;  %s2254_s18 = smov 0   ;;  %s2256_s19 = smov 0  }
  0x15   :  { %s2258_s20 = smov 0   ;;  %s2260_s21 = smov 0  }
  0x16 LB: > { %2781 = sst [smem:[#allocation23_spill]] %s2145_s18  ;;  %s2159_s22 = smov [#allocation8]   ;;  %s2157_s21 = sphi %s2260_s21, %s2831_s21   ;;  %s2153_s20 = sphi %s2258_s20, %s2835_s20   ;;  %s2149_s19 = sphi %s2256_s19, %s2834_s19   ;;  %s2145_s18 = sphi %s2254_s18, %s2833_s18  }
  0x17   : > { %2782 = sst [smem:[#allocation24_spill]] %s2157_s21  ;;  %s418_s23 = sshll.u32 %s2159_s22, 4  ;;  %s2280_s23 = int_to_ptr.vmem [resolvable:$true] %s418_s23 }
  0x18   : > { %s2275_s24 = sadd.s32 4294967295, %s2157_s21   ;;  %p1401_p0 = scmp.ge.s32.totalorder %s2157_s21, 1 }
  0x19   : > { %2783 = sst [smem:[#allocation25_spill]] %s2275_s24  ;;  %p2754_p1 = scmp.eq.s32.totalorder %s2275_s24, 0 }
  0x1a   : > { %p403_p2 = scmp.lt.s32.totalorder %s2157_s21, 3  ;;  %s2160_s26 = smov [#allocation11]  }
  0x1b   : > { %s450_s27 = sshll.u32 %s2160_s26, 4  ;;  %s2786_s5 = sld [smem:[#allocation33_spill]]  ;;  %s2295_s27 = int_to_ptr.vmem [resolvable:$true] %s450_s27 }
  0x1c   : > { %p2282_p3 = pnand %p1401_p0, %p403_p2 }
  0x1e   : > { %s2784_s25 = scalar_select %p2282_p3, 1, 0 }
  0x1f   : > { %p1759_p5 = pneg %p2282_p3 }
  0x21   : > { %p2291_p6 = pnand %p1759_p5, %p2754_p1  ;;  %s1845_s16 = scalar_lea.hbm %s2786_s5, 512 }
  0x22   : > { %p1846_p7 = scmp.ne.s32.totalorder %s2786_s5, %s1845_s16  ;;  %p1852_p11 = scmp.lt.u32.totalorder %s1845_s16, %s2786_s5 }
  0x23   : > { %s2785_s28 = scalar_select %p2291_p6, 1, 0 }
  0x24   : > { %p2305_p8 = pneg %p2291_p6 }
  0x26   : > { %s2787_s15 = scalar_select %p2305_p8, 1, 0 }
  0x27   : > { %p1848_p9 = pnand %p2305_p8, %p1846_p7 }
  0x29   : > { %p1849_p10 = pneg %p1848_p9 }
  0x2b   : > { %p1854_p12 = pnand %p1852_p11, %p1849_p10 }
  0x2d   : > { %1857 = shalt.err (!%p1854_p12)
}
  0x2e   : > { %s1858_s29 = scalar_lea.vmem %s2280_s23, 512  ;;  %p1866_p5 = scmp.lt.s32.totalorder %s2280_s23, %s2280_s23 }
  0x2f   : > { %p1859_p13 = scmp.ne.s32.totalorder %s2280_s23, %s1858_s29  ;;  %p1867_p4 = scmp.lt.s32.totalorder %s1858_s29, %s1858_s29 }
  0x31   : > { %p1861_p0 = pnand %p1859_p13, %p2305_p8  ;;  %p1868_p7 = por %p1867_p4, %p1866_p5 }
  0x33   : > { %p1862_p2 = pneg %p1861_p0 }
  0x35   : > { %p1869_p9 = pnand %p1868_p7, %p1862_p2 }
  0x37   : > { %1872 = shalt.err (!%p1869_p9)
}
  0x38   : > { %s2744_s30 = smov 128   ;;  %s2746_s14 = smov 8  }
  0x39   : > { %1762 = dma.hbm_to_vmem [thread:$0]  (!%p2291_p6), %s2786_s5, 512, %s2280_s23, [#allocation9], %s2744_s30, %s2744_s30, %s2746_s14  }
  0x3a   : > { %s2788_s9 = sld [smem:[#allocation36_spill]] }
  0x40   : > { %s1873_s29 = scalar_lea.hbm %s2788_s9, 2048 }
  0x41   : > { %p1874_p4 = scmp.ne.s32.totalorder %s2788_s9, %s1873_s29  ;;  %p1880_p12 = scmp.lt.u32.totalorder %s1873_s29, %s2788_s9 }
  0x43   : > { %p1876_p10 = pnand %p1874_p4, %p2305_p8 }
  0x45   : > { %p1877_p11 = pneg %p1876_p10 }
  0x47   : > { %p1882_p13 = pnand %p1880_p12, %p1877_p11 }
  0x49   : > { %1885 = shalt.err (!%p1882_p13)
}
  0x4a   : > { %s1886_s23 = scalar_lea.vmem %s2295_s27, 2048  ;;  %p1894_p7 = scmp.lt.s32.totalorder %s2295_s27, %s2295_s27 }
  0x4b   : > { %p1887_p0 = scmp.ne.s32.totalorder %s2295_s27, %s1886_s23  ;;  %p1895_p9 = scmp.lt.s32.totalorder %s1886_s23, %s1886_s23 }
  0x4d   : > { %p1889_p2 = pnand %p1887_p0, %p2305_p8  ;;  %p1896_p4 = por %p1895_p9, %p1894_p7 }
  0x4f   : > { %p1890_p5 = pneg %p1889_p2 }
  0x51   : > { %p1897_p10 = pnand %p1896_p4, %p1890_p5 }
  0x53   : > { %1900 = shalt.err (!%p1897_p10)
}
  0x54   : > { %1768 = dma.hbm_to_vmem [thread:$0]  (!%p2291_p6), %s2788_s9, 2048, %s2295_s27, [#allocation12], %s2744_s30, %s2744_s30, %s2746_s14  }
  0x55   : > { %s1400_s10 = sadd.s32 4294967294, %s2157_s21   ;;  %s2357_s12 = sadd.s32 1, %s2157_s21  }
  0x56   : > { %2789 = sst [smem:[#allocation26_spill]] %s2357_s12  ;;  %s41_s16 = ssub.s32 %s2157_s21, %s2357_s12 }
  0x57   : > { %s44_s17 = sadd.s32 1, %s2153_s20  ;;  %p42_p11 = scmp.eq.s32.totalorder %s41_s16, 0 }
  0x58   : > { %p51_p12 = scmp.ne.s32.totalorder %s2153_s20, %s2149_s19  ;;  %p52_p13 = scmp.eq.s32.totalorder %s2157_s21, 0 }
  0x59   : > { %p57_p0 = scmp.ne.s32.totalorder %s2149_s19, %s2145_s18  ;;  %p390_p7 = scmp.eq.s32.totalorder %s2275_s24, 1 }
  0x5a   : > { %s2368_s22 = scalar_select %p42_p11, %s2153_s20, %s44_s17  }
  0x5b   : > { %p53_p2 = por %p52_p13, %p51_p12  ;;  %p2372_p5 = por %p2754_p1, %p57_p0 }
  0x5c   : > { %2790 = sst [smem:[#allocation27_spill]] %s2368_s22  ;;  %p396_p9 = scmp.eq.s32.totalorder %s1400_s10, 1 }
  0x5d   : > { %s2791_s26 = scalar_select %p2372_p5, 1, 0 }
  0x5e   : > { %p1794_p4 = scmp.lt.s32.totalorder %s2157_s21, 2  ;;  %s2748_s27 = sand.u32 1, %s2153_s20  }
  0x5f   : > { %p2379_p10 = por %p390_p7, %p51_p12  ;;  %p2383_p3 = por %p396_p9, %p57_p0 }
  0x60   : > { %s2389_s7 = sshll.u32 %s2748_s27, 3  ;;  %s2392_s8 = sshll.u32 %s2157_s21, 7 }
  0x61   : > { %s2792_s29 = scalar_select %p2379_p10, 1, 0 }
  0x62   : > { %s2794_s23 = scalar_select %p2383_p3, 1, 0 }
  0x63   : > { %2793 = sst [smem:[#allocation28_spill]] %s2792_s29  ;;  %p2394_p11 = pnand %p1794_p4, %p53_p2 }
  0x64   : > { %2795 = sst [smem:[#allocation29_spill]] %s2794_s23  ;;  %s517_s10 = sand.u32 1, %s2157_s21  }
  0x65   : > { %s2796_s16 = scalar_select %p2394_p11, 1, 0 }
  0x66   : > { %s2797_s1 = sld [smem:[#allocation30_spill]]  ;;  %s521_s27 = scalar_lea.vmem [#allocation5], %s2389_s7 }
  0x67   : > { %s528_s5 = sshll.u32 %s521_s27, 4  ;;  %s2163_s9 = smov [#allocation10]   ;;  %s2406_s5 = int_to_ptr.vmem [resolvable:$true] %s528_s5 }
  0x68   : > { %s2408_s22 = sshll.u32 %s2163_s9, 4  ;;  %s2410_s12 = scalar_lea.sflag [#allocation6], %s517_s10  ;;  %s432_s22 = int_to_ptr.vmem [resolvable:$true] %s2408_s22 }
  0x69   : > { %p2416_p13 = pneg %p2394_p11 }
  0x6b   : > { %s2798_s30 = scalar_select %p2416_p13, 1, 0 }
  0x6c   : > { %s2403_s14 = scalar_lea.hbm %s2797_s1, %s2392_s8  ;;  %s1906_s21 = scalar_lea.hbm %s2797_s1, 256 }
  0x6d   : > { %s1901_s23 = scalar_lea.hbm %s2403_s14, 128  ;;  %p1907_p7 = scmp.lt.u32.totalorder %s2403_s14, %s2797_s1 }
  0x6e   : > { %p1902_p12 = scmp.ne.s32.totalorder %s2403_s14, %s1901_s23  ;;  %p1908_p9 = scmp.lt.u32.totalorder %s1906_s21, %s1901_s23 }
  0x6f   : > { %p1910_p1 = scmp.lt.u32.totalorder %s1901_s23, %s2403_s14 }
  0x70   : > { %p1904_p0 = pnand %p2416_p13, %p1902_p12  ;;  %p1909_p4 = por %p1908_p9, %p1907_p7 }
  0x72   : > { %p1905_p2 = pneg %p1904_p0  ;;  %p1911_p3 = por %p1910_p1, %p1909_p4 }
  0x74   : > { %p1912_p10 = pnand %p1911_p3, %p1905_p2 }
  0x76   : > { %1915 = shalt.err (!%p1912_p10)
}
  0x77   : > { %s1916_s10 = scalar_lea.vmem %s2406_s5, 128  ;;  %s2164_s17 = smov [#allocation5]  }
  0x78   : > { %p1917_p12 = scmp.ne.s32.totalorder %s2406_s5, %s1916_s10  ;;  %s1921_s27 = sshll.u32 %s2164_s17, 4  ;;  %s1922_s27 = int_to_ptr.vmem [resolvable:$false] %s1921_s27 }
  0x79   : > { %s1923_s18 = scalar_lea.vmem %s1922_s27, 256  ;;  %p1924_p6 = scmp.lt.s32.totalorder %s2406_s5, %s1922_s27 }
  0x7a   : > { %p1919_p0 = pnand %p1917_p12, %p2416_p13  ;;  %p1925_p8 = scmp.lt.s32.totalorder %s1923_s18, %s1916_s10 }
  0x7c   : > { %p1920_p5 = pneg %p1919_p0  ;;  %p1926_p7 = por %p1925_p8, %p1924_p6 }
  0x7e   : > { %p1927_p9 = pnand %p1926_p7, %p1920_p5 }
  0x80   : > { %1930 = shalt.err (!%p1927_p9)
}
  0x81   : > { %1781 = dma.hbm_to_vmem [thread:$0]  (!%p2394_p11), %s2403_s14, 128, %s2406_s5, %s2410_s12  }
  0x82   : > { %s1931_s9 = scalar_lea.hbm %s2732_s6, 512  ;;  %p2799_p3 = scmp.ne.s32.totalorder %s2787_s15, 0 }
  0x83   : > { %p1932_p1 = scmp.ne.s32.totalorder %s2732_s6, %s1931_s9  ;;  %p1938_p5 = scmp.lt.u32.totalorder %s1931_s9, %s2732_s6 }
  0x85   : > { %p1934_p6 = pnand %p1932_p1, %p2799_p3 }
  0x87   : > { %p1935_p8 = pneg %p1934_p6 }
  0x89   : > { %p1940_p10 = pnand %p1938_p5, %p1935_p8 }
  0x8b   : > { %1943 = shalt.err (!%p1940_p10)
}
  0x8c   : > { %s1944_s18 = scalar_lea.vmem %s432_s22, 512  ;;  %p1952_p0 = scmp.lt.s32.totalorder %s432_s22, %s432_s22 }
  0x8d   : > { %p1945_p2 = scmp.ne.s32.totalorder %s432_s22, %s1944_s18  ;;  %p1953_p7 = scmp.lt.s32.totalorder %s1944_s18, %s1944_s18 }
  0x8f   : > { %p1947_p4 = pnand %p1945_p2, %p2799_p3  ;;  %p1954_p9 = por %p1953_p7, %p1952_p0 }
  0x91   : > { %p1948_p12 = pneg %p1947_p4 }
  0x93   : > { %p1955_p11 = pnand %p1954_p9, %p1948_p12 }
  0x95   : > { %1958 = shalt.err (!%p1955_p11)
}
  0x96   : > { %p2800_p1 = scmp.ne.s32.totalorder %s2785_s28, 0  ;;  %s2801_s1 = smov 8  }
  0x97   : > { %s2802_s5 = smov 128   ;;  %s2165_s23 = smov [#allocation13]  }
  0x98   : > { %1765 = dma.hbm_to_vmem [thread:$0]  (!%p2800_p1), %s2732_s6, 512, %s432_s22, [#allocation9], %s2802_s5, %s2802_s5, %s2801_s1  }
  0x99   : > { %s466_s9 = sshll.u32 %s2165_s23, 4  ;;  %s2166_s17 = smov [#allocation14]   ;;  %s467_s9 = int_to_ptr.vmem [resolvable:$true] %s466_s9 }
  0x9a   : > { %s482_s10 = sshll.u32 %s2166_s17, 4  ;;  %s1959_s29 = scalar_lea.hbm %s2737_s11, 2048  ;;  %s483_s10 = int_to_ptr.vmem [resolvable:$true] %s482_s10 }
  0x9b   : > { %p1960_p11 = scmp.ne.s32.totalorder %s2737_s11, %s1959_s29  ;;  %p1966_p5 = scmp.lt.u32.totalorder %s1959_s29, %s2737_s11 }
  0x9d   : > { %p1962_p6 = pnand %p1960_p11, %p2799_p3 }
  0x9f   : > { %p1963_p8 = pneg %p1962_p6 }
  0xa1   : > { %p1968_p10 = pnand %p1966_p5, %p1963_p8 }
  0xa3   : > { %1971 = shalt.err (!%p1968_p10)
}
  0xa4   : > { %s1972_s22 = scalar_lea.vmem %s467_s9, 2048  ;;  %p1980_p0 = scmp.lt.s32.totalorder %s467_s9, %s467_s9 }
  0xa5   : > { %p1973_p2 = scmp.ne.s32.totalorder %s467_s9, %s1972_s22  ;;  %p1981_p7 = scmp.lt.s32.totalorder %s1972_s22, %s1972_s22 }
  0xa7   : > { %p1975_p4 = pnand %p1973_p2, %p2799_p3  ;;  %p1982_p9 = por %p1981_p7, %p1980_p0 }
  0xa9   : > { %p1976_p12 = pneg %p1975_p4 }
  0xab   : > { %p1983_p13 = pnand %p1982_p9, %p1976_p12 }
  0xad   : > { %1986 = shalt.err (!%p1983_p13)
}
  0xae   : > { %1771 = dma.hbm_to_vmem [thread:$0]  (!%p2800_p1), %s2737_s11, 2048, %s467_s9, [#allocation12], %s2802_s5, %s2802_s5, %s2801_s1  }
  0xaf   : > { %s1987_s21 = scalar_lea.hbm %s2739_s13, 2048 }
  0xb0   : > { %p1988_p11 = scmp.ne.s32.totalorder %s2739_s13, %s1987_s21  ;;  %p1994_p8 = scmp.lt.u32.totalorder %s1987_s21, %s2739_s13 }
  0xb2   : > { %p1990_p13 = pnand %p1988_p11, %p2799_p3 }
  0xb4   : > { %p1991_p6 = pneg %p1990_p13 }
  0xb6   : > { %p1996_p5 = pnand %p1994_p8, %p1991_p6 }
  0xb8   : > { %1999 = shalt.err (!%p1996_p5)
}
  0xb9   : > { %s2000_s14 = scalar_lea.vmem %s483_s10, 2048  ;;  %p2008_p12 = scmp.lt.s32.totalorder %s483_s10, %s483_s10 }
  0xba   : > { %p2001_p10 = scmp.ne.s32.totalorder %s483_s10, %s2000_s14  ;;  %p2009_p0 = scmp.lt.s32.totalorder %s2000_s14, %s2000_s14 }
  0xbc   : > { %p2003_p2 = pnand %p2001_p10, %p2799_p3  ;;  %p2010_p7 = por %p2009_p0, %p2008_p12 }
  0xbe   : > { %p2004_p4 = pneg %p2003_p2 }
  0xc0   : > { %p2011_p9 = pnand %p2010_p7, %p2004_p4 }
  0xc2   : > { %2014 = shalt.err (!%p2011_p9)
}
  0xc3   : > { %1774 = dma.hbm_to_vmem [thread:$0]  (!%p2800_p1), %s2739_s13, 2048, %s483_s10, [#allocation15], %s2802_s5, %s2802_s5, %s2801_s1  }
  0xc4   : > { %s2508_s4 = scalar_lea.hbm %s2726_s0, %s2392_s8  ;;  %s503_s28 = scalar_lea.vmem [#allocation2], %s2389_s7 }
  0xc5   : > { %s510_s24 = sshll.u32 %s503_s28, 4  ;;  %s2517_s23 = scalar_lea.hbm %s2728_s2, %s2392_s8  ;;  %s2511_s24 = int_to_ptr.vmem [resolvable:$true] %s510_s24 }
  0xc6   : > { %s2803_s17 = sand.u32 1, %s2153_s20   ;;  %s2015_s5 = scalar_lea.hbm %s2508_s4, 128 }
  0xc7   : > { %s500_s1 = scalar_lea.sflag [#allocation3], %s2803_s17  ;;  %p2016_p3 = scmp.ne.s32.totalorder %s2508_s4, %s2015_s5 }
  0xc8   : > { %p2804_p1 = scmp.ne.s32.totalorder %s2798_s30, 0  ;;  %s2020_s18 = scalar_lea.hbm %s2726_s0, 256 }
  0xc9   : > { %p2021_p6 = scmp.lt.u32.totalorder %s2508_s4, %s2726_s0  ;;  %p2022_p8 = scmp.lt.u32.totalorder %s2020_s18, %s2015_s5 }
  0xca   : > { %p2018_p11 = pnand %p2016_p3, %p2804_p1  ;;  %p2024_p10 = scmp.lt.u32.totalorder %s2015_s5, %s2508_s4 }
  0xcb   : > { %p2023_p5 = por %p2022_p8, %p2021_p6 }
  0xcc   : > { %p2019_p13 = pneg %p2018_p11 }
  0xcd   : > { %p2025_p2 = por %p2024_p10, %p2023_p5 }
  0xcf   : > { %p2026_p4 = pnand %p2025_p2, %p2019_p13 }
  0xd1   : > { %2029 = shalt.err (!%p2026_p4)
}
  0xd2   : > { %s2030_s8 = scalar_lea.vmem %s2511_s24, 128  ;;  %s2167_s22 = smov [#allocation2]  }
  0xd3   : > { %p2031_p12 = scmp.ne.s32.totalorder %s2511_s24, %s2030_s8  ;;  %s2035_s15 = sshll.u32 %s2167_s22, 4  ;;  %s2036_s15 = int_to_ptr.vmem [resolvable:$false] %s2035_s15 }
  0xd4   : > { %s2037_s3 = scalar_lea.vmem %s2036_s15, 256  ;;  %p2038_p9 = scmp.lt.s32.totalorder %s2511_s24, %s2036_s15 }
  0xd5   : > { %p2033_p0 = pnand %p2031_p12, %p2804_p1  ;;  %p2039_p3 = scmp.lt.s32.totalorder %s2037_s3, %s2030_s8 }
  0xd7   : > { %p2034_p7 = pneg %p2033_p0  ;;  %p2040_p11 = por %p2039_p3, %p2038_p9 }
  0xd9   : > { %p2041_p6 = pnand %p2040_p11, %p2034_p7 }
  0xdb   : > { %2044 = shalt.err (!%p2041_p6)
}
  0xdc   : > { %p2805_p13 = scmp.ne.s32.totalorder %s2796_s16, 0  ;;  %s539_s28 = scalar_lea.vmem [#allocation7], %s2389_s7 }
  0xdd   : > { %s546_s29 = sshll.u32 %s539_s28, 4  ;;  %s2045_s21 = scalar_lea.hbm %s2517_s23, 128  ;;  %s547_s29 = int_to_ptr.vmem [resolvable:$true] %s546_s29 }
  0xde   : > { %1778 = dma.hbm_to_vmem [thread:$0]  (!%p2805_p13), %s2508_s4, 128, %s2511_s24, %s500_s1  }
  0xdf   : > { %p2046_p8 = scmp.ne.s32.totalorder %s2517_s23, %s2045_s21  ;;  %s2050_s10 = scalar_lea.hbm %s2728_s2, 256 }
  0xe0   : > { %p2051_p2 = scmp.lt.u32.totalorder %s2517_s23, %s2728_s2  ;;  %p2052_p4 = scmp.lt.u32.totalorder %s2050_s10, %s2045_s21 }
  0xe1   : > { %p2048_p5 = pnand %p2046_p8, %p2804_p1  ;;  %p2054_p0 = scmp.lt.u32.totalorder %s2045_s21, %s2517_s23 }
  0xe2   : > { %p2053_p12 = por %p2052_p4, %p2051_p2 }
  0xe3   : > { %p2049_p10 = pneg %p2048_p5 }
  0xe4   : > { %p2055_p7 = por %p2054_p0, %p2053_p12 }
  0xe6   : > { %p2056_p9 = pnand %p2055_p7, %p2049_p10 }
  0xe8   : > { %2059 = shalt.err (!%p2056_p9)
}
  0xe9   : > { %s2060_s7 = scalar_lea.vmem %s547_s29, 128  ;;  %s2168_s4 = smov [#allocation7]  }
  0xea   : > { %p2061_p3 = scmp.ne.s32.totalorder %s547_s29, %s2060_s7  ;;  %s2065_s24 = sshll.u32 %s2168_s4, 4  ;;  %s2066_s24 = int_to_ptr.vmem [resolvable:$false] %s2065_s24 }
  0xeb   : > { %s2067_s1 = scalar_lea.vmem %s2066_s24, 256  ;;  %p2068_p8 = scmp.lt.s32.totalorder %s547_s29, %s2066_s24 }
  0xec   : > { %p2063_p11 = pnand %p2061_p3, %p2804_p1  ;;  %p2069_p5 = scmp.lt.s32.totalorder %s2067_s1, %s2060_s7 }
  0xee   : > { %p2064_p6 = pneg %p2063_p11  ;;  %p2070_p13 = por %p2069_p5, %p2068_p8 }
  0xf0   : > { %p2071_p2 = pnand %p2070_p13, %p2064_p6 }
  0xf2   : > { %2074 = shalt.err (!%p2071_p2)
}
  0xf3   : > { %p2806_p4 = scmp.ne.s32.totalorder %s2796_s16, 0  ;;  %p2807_p10 = scmp.ne.s32.totalorder %s2784_s25, 0 }
  0xf4   : > { %s2564_s30 = sand.u32 (!%p2807_p10), 1, %s2149_s19   ;;  %p2808_p1 = scmp.ne.s32.totalorder (!%p2807_p10), %s2791_s26, 0 }
  0xf5   : > { %1784 = dma.hbm_to_vmem [thread:$0]  (!%p2806_p4), %s2517_s23, 128, %s547_s29, %s2410_s12  }
  0xf6   : > { %562 = sbr.rel (%p2807_p10) target bundleno = 1180 (0x49c), region = 80  ;;  %s2567_s14 = sshll.u32 (!%p2807_p10), %s2564_s30, 3 }
  0xf7   : > { %s565_s9 = scalar_lea.sflag (!%p2807_p10), [#allocation3], %s2564_s30  ;;  %s568_s8 = scalar_lea.vmem (!%p2807_p10), [#allocation2], %s2567_s14 }
  0xfd   : > { %2120 = dma.done.wait (%p2808_p1), %s565_s9, 128  }
  0xfe   : > { %2122 = vsyncadd (%p2808_p1), %s565_s9, 4294967168  ;;  %s2809_s12 = sld [smem:[#allocation25_spill]]  ;;  %s577_s23 = scalar_lea.vmem [#allocation5], %s2567_s14 }
 0x104   : > { %s573_s25 = sand.u32 1, %s2809_s12  }
 0x105   : > { %s574_s16 = scalar_lea.sflag [#allocation6], %s573_s25 }
 0x106   : > { %2124 = dma.done.wait (%p2808_p1), %s574_s16, 256  }
 0x107   : > { %2126 = vsyncadd (%p2808_p1), %s574_s16, 4294967040  ;;  %s586_s22 = scalar_lea.vmem [#allocation7], %s2567_s14  ;;  %p2810_p13 = scmp.eq.s32.totalorder %s2809_s12, 0 }
 0x109   : > { %2128 = dma.done.wait (%p2810_p13), [#allocation9], 1024   ;;  %p2811_p12 = pmov %p2810_p13 }
 0x10b   : > { %2130 = vsyncadd (%p2811_p12), [#allocation9], 4294966272  ;;  %p2812_p0 = pmov %p2811_p12 }
 0x10d   : > { %2132 = dma.done.wait (%p2812_p0), [#allocation12], 4096   ;;  %p2813_p7 = pmov %p2812_p0 }
 0x10e   : > { %p2814_p9 = pmov %p2812_p0 }
 0x10f   : > { %2134 = vsyncadd (%p2813_p7), [#allocation12], 4294963200 }
 0x110   : > { %2136 = dma.done.wait (%p2814_p9), [#allocation15], 2048   ;;  %p2815_p3 = pmov %p2812_p0 }
 0x111   : > { %v2169_v0 = vmov 0.0|0.0   ;;  %vm2170_vm0 = vmmov 0   ;;  %v2171_v1 = vmov 0.0   ;;  %p667_p11 = scmp.lt.s32.totalorder %s2809_s12, 1  ;;  %v2172_v2 = vmov 0   ;;  %v677_v3 = vld [vmem:[#allocation8] sm:$0xff] }
 0x112   : > { %2138 = vsyncadd (%p2815_p3), [#allocation15], 4294965248  ;;  %1641 = vmatprep.subr.bf16.mxu0 %v2169_v0  ;;  %1511 = vmatprep.mubr.msk.f32.mxu0 %vm2170_vm0, %v2171_v1  ;;  %v678_v4 = vld [vmem:[#allocation8 + $0x8] sm:$0xff]  ;;  %v679_v5 = vld [vmem:[#allocation8 + $0x10] sm:$0xff]  ;;  %s2816_s29 = sld [smem:[#allocation31_spill]]  ;;  %s2817_s10 = sld [smem:[#allocation32_spill]] }
 0x113   : > { %1844 = vset.pattern.permute.xlu0 %v2172_v2  ;;  %1659 = vmatprep.subr.bf16.mxu1 %v2169_v0  ;;  %s668_s26 = scalar_select %p667_p11, %s2809_s12, 1  ;;  %v1642_v6 = vpack.c.bf16 %v678_v4, %v677_v3  ;;  %v680_v7 = vld [vmem:[#allocation8 + $0x18] sm:$0xff]  ;;  %v931_v12 = vld [vmem:[#allocation11] sm:$0xff]  ;;  %v932_v13 = vld [vmem:[#allocation11 + $0x8] sm:$0xff]  ;;  %vm681_vm1 = vcmask 261120  }
 0x114   : > { %1568 = vmatprep.mubr.msk.f32.mxu1 %vm2170_vm0, %v2171_v1  ;;  %v1645_v8 = vpack.c.bf16 %v680_v7, %v679_v5  ;;  %v1660_v14 = vpack.c.bf16 %v932_v13, %v931_v12  ;;  %v933_v15 = vld [vmem:[#allocation11 + $0x10] sm:$0xff]  ;;  %v934_v16 = vld [vmem:[#allocation11 + $0x18] sm:$0xff]  ;;  %v676_v17 = vld [vmem:[%s577_s23] sm:$0xff]  ;;  %s2818_s25 = sld [smem:[#allocation34_spill]]  ;;  %s2820_s3 = sld [smem:[#allocation37_spill]] }
 0x115   : > { %s1424_s15 = sshll.u32 %s668_s26, 3  ;;  %1643 = vmatpush3.bf16.msra.mxu0 %v1642_v6  ;;  %v1663_v21 = vpack.c.bf16 %v934_v16, %v933_v15  ;;  %v829_v23 = vld [vmem:[#allocation10] sm:$0xff]  ;;  %v830_v24 = vld [vmem:[#allocation10 + $0x8] sm:$0xff]  ;;  %v671_v25 = vld [vmem:[%s568_s8] sm:$0xff]  ;;  %s2822_s17 = sld [smem:[#allocation28_spill]] }
 0x116   : > { %1644 = vmatprep.subr.bf16.mxu0 %v2169_v0  ;;  %1661 = vmatpush3.bf16.msra.mxu1 %v1660_v14  ;;  %v1654_v26 = vpack.c.bf16 %v830_v24, %v829_v23  ;;  %v831_v27 = vld [vmem:[#allocation10 + $0x10] sm:$0xff]  ;;  %v832_v28 = vld [vmem:[#allocation10 + $0x18] sm:$0xff]  ;;  %v935_v31 = vld [vmem:[#allocation11 + $0x20] sm:$0xff]  ;;  %s2823_s18 = sld [smem:[#allocation39_spill]]  ;;  %s1434_s7 = sshll.u32 %s2809_s12, 7 }
 0x117   : > { %1662 = vmatprep.subr.bf16.mxu1 %v2169_v0  ;;  %v1657_v29 = vpack.c.bf16 %v832_v28, %v831_v27  ;;  %v828_v30 = vld [vmem:[%s586_s22] sm:$0xff]  ;;  %v936_v32 = vld [vmem:[#allocation11 + $0x28] sm:$0xff]  ;;  %v939_v37 = vld [vmem:[#allocation11 + $0x40] sm:$0xff]  ;;  %s2819_s22 = sld [smem:[#allocation35_spill]]  ;;  %s666_s4 = scalar_lea.vmem [#allocation16], %s2567_s14 }
 0x118   : > { %s670_s21 = scalar_lea.vmem %s2816_s29, %s1424_s15  ;;  %v672_v9 = vld [vmem:[%s2817_s10] sm:$0xff]  ;;  %v673_v10 = vld [vmem:[%s2817_s10 + $0x8] sm:$0xff]  ;;  %v674_v19 = vld [vmem:[%s2817_s10 + $0x10] sm:$0xff]  ;;  %v1666_v33 = vpack.c.bf16 %v936_v32, %v935_v31  ;;  %s1227_s24 = sshll.u32 %s666_s4, 4  ;;  %s2684_s24 = int_to_ptr.vmem [resolvable:$true] %s1227_s24 }
 0x119   : > { %v907_v11 = vld [vmem:[%s670_s21] sm:$0xff]  ;;  %1646 = vmatpush3.bf16.msra.mxu0 %v1645_v8  ;;  %v1648_v18 = vpack.c.bf16 %v673_v10, %v672_v9  ;;  %v675_v20 = vld [vmem:[%s2817_s10 + $0x18] sm:$0xff]  ;;  %v938_v35 = vld [vmem:[#allocation11 + $0x38] sm:$0xff]  ;;  %s2821_s21 = sld [smem:[#allocation38_spill]]  ;;  %s2824_s8 = sld [smem:[#allocation40_spill]] }
 0x11a   : > { %911 = vperm.xlu0 %1844, %v907_v11   ;;  %1647 = vmatprep.subr.bf16.mxu0 %v2169_v0  ;;  %v1651_v22 = vpack.c.bf16 %v675_v20, %v674_v19  ;;  %v937_v34 = vld [vmem:[#allocation11 + $0x30] sm:$0xff]  ;;  %v940_v38 = vld [vmem:[#allocation11 + $0x48] sm:$0xff]  ;;  %v942_v41 = vld [vmem:[#allocation11 + $0x58] sm:$0xff]  ;;  %s1214_s16 = scalar_lea.sflag [#allocation4], %s2564_s30  ;;  %s2075_s23 = scalar_lea.vmem %s2684_s24, 128 }
 0x11b   : > { %1664 = vmatpush3.bf16.msra.mxu1 %v1663_v21  ;;  %v1669_v36 = vpack.c.bf16 %v938_v35, %v937_v34  ;;  %v1672_v39 = vpack.c.bf16 %v940_v38, %v939_v37  ;;  %v941_v40 = vld [vmem:[#allocation11 + $0x50] sm:$0xff]  ;;  %v943_v43 = vld [vmem:[#allocation11 + $0x60] sm:$0xff]  ;;  %v944_v44 = vld [vmem:[#allocation11 + $0x68] sm:$0xff]  ;;  %p2076_p6 = scmp.ne.s32.totalorder %s2684_s24, %s2075_s23  ;;  %p2825_p8 = scmp.ne.s32.totalorder %s2822_s17, 0 }
 0x11c   : > { %1512 = vmatmul.mubr.msk.f32.vlgmr.msra.gmra.mrb[0].mxu0 %vm681_vm1, %v676_v17  ;;  %1665 = vmatprep.subr.bf16.mxu1 %v2169_v0  ;;  %v1675_v42 = vpack.c.bf16 %v942_v41, %v941_v40  ;;  %v1678_v45 = vpack.c.bf16 %v944_v44, %v943_v43  ;;  %v945_v46 = vld [vmem:[#allocation11 + $0x70] sm:$0xff]  ;;  %v946_v47 = vld [vmem:[#allocation11 + $0x78] sm:$0xff]  ;;  %v1025_v49 = vld [vmem:[#allocation13] sm:$0xff]  ;;  %s2173_s14 = smov [#allocation16]  }
 0x11d   : > { %1649 = vmatpush3.bf16.msra.mxu0 %v1648_v18  ;;  %1522 = vmatprep.mubr.msk.f32.mxu0 %vm2170_vm0, %v2171_v1  ;;  %v1681_v48 = vpack.c.bf16 %v946_v47, %v945_v46  ;;  %v1026_v50 = vld [vmem:[#allocation13 + $0x8] sm:$0xff]  ;;  %v1027_v51 = vld [vmem:[#allocation13 + $0x10] sm:$0xff]  ;;  %v1028_v53 = vld [vmem:[#allocation13 + $0x18] sm:$0xff]  ;;  %p2077_p5 = pnand %p2076_p6, %p2825_p8  ;;  %s2079_s12 = sshll.u32 %s2173_s14, 4  ;;  %s2080_s12 = int_to_ptr.vmem [resolvable:$false] %s2079_s12 }
 0x11e   : > { %1650 = vmatprep.subr.bf16.mxu0 %v2169_v0  ;;  %v1684_v52 = vpack.c.bf16 %v1026_v50, %v1025_v49  ;;  %v1687_v54 = vpack.c.bf16 %v1028_v53, %v1027_v51  ;;  %v1029_v55 = vld [vmem:[#allocation13 + $0x20] sm:$0xff]  ;;  %v1030_v56 = vld [vmem:[#allocation13 + $0x28] sm:$0xff]  ;;  %v1031_v58 = vld [vmem:[#allocation13 + $0x30] sm:$0xff]  ;;  %p2082_p4 = scmp.lt.s32.totalorder %s2684_s24, %s2080_s12 }
 0x11f   : > { %1667 = vmatpush3.bf16.msra.mxu1 %v1666_v33  ;;  %v1690_v57 = vpack.c.bf16 %v1030_v56, %v1029_v55  ;;  %v1032_v59 = vld [vmem:[#allocation13 + $0x38] sm:$0xff]  ;;  %v1033_v61 = vld [vmem:[#allocation13 + $0x40] sm:$0xff]  ;;  %v1034_v62 = vld [vmem:[#allocation13 + $0x48] sm:$0xff]  ;;  %p2078_p2 = pneg %p2077_p5 }
 0x120   : > { %1668 = vmatprep.subr.bf16.mxu1 %v2169_v0  ;;  %v1693_v60 = vpack.c.bf16 %v1032_v59, %v1031_v58  ;;  %v1696_v63 = vpack.c.bf16 %v1034_v62, %v1033_v61  ;;  %v1035_v2 = vld [vmem:[#allocation13 + $0x50] sm:$0xff]  ;;  %v1036_v3 = vld [vmem:[#allocation13 + $0x58] sm:$0xff]  ;;  %v1037_v5 = vld [vmem:[#allocation13 + $0x60] sm:$0xff] }
 0x121   : > { %1652 = vmatpush3.bf16.msra.mxu0 %v1651_v22  ;;  %v1699_v4 = vpack.c.bf16 %v1036_v3, %v1035_v2  ;;  %v1038_v6 = vld [vmem:[#allocation13 + $0x68] sm:$0xff]  ;;  %v1428_v13 = vld [vmem:[%s2818_s25] ss:$0 sm:$0xff]  ;;  %v1040_v24 = vld [vmem:[#allocation13 + $0x78] sm:$0xff]  ;;  %s2682_s25 = scalar_lea.hbm %s2824_s8, %s1434_s7 }
 0x122   : > { %1653 = vmatprep.subr.bf16.mxu0 %v2169_v0  ;;  %v1702_v7 = vpack.c.bf16 %v1038_v6, %v1037_v5  ;;  %v1429_v19 = vld [vmem:[%s2819_s22] ss:$0 sm:$0xff]  ;;  %v1120_v27 = vld [vmem:[#allocation14 + $0x8] sm:$0xff]  ;;  %v1123_v32 = vld [vmem:[#allocation14 + $0x20] sm:$0xff]  ;;  %s2081_s22 = scalar_lea.vmem %s2080_s12, 256 }
 0x123   : > { %1670 = vmatpush3.bf16.msra.mxu1 %v1669_v36  ;;  %v1039_v23 = vld [vmem:[#allocation13 + $0x70] sm:$0xff]  ;;  %v1124_v33 = vld [vmem:[#allocation14 + $0x28] sm:$0xff]  ;;  %v1126_v35 = vld [vmem:[#allocation14 + $0x38] sm:$0xff]  ;;  %p2083_p10 = scmp.lt.s32.totalorder %s2081_s22, %s2075_s23 }
 0x124   : > { %1523 = vmatmul.mubr.msk.f32.vlgmr.msra.gmra.mrb[2].mxu0 %vm681_vm1, %v671_v25  ;;  %1671 = vmatprep.subr.bf16.mxu1 %v2169_v0  ;;  %v1705_v25 = vpack.c.bf16 %v1040_v24, %v1039_v23  ;;  %v1121_v28 = vld [vmem:[#allocation14 + $0x10] sm:$0xff]  ;;  %v1714_v34 = vpack.c.bf16 %v1124_v33, %v1123_v32  ;;  %v1127_v37 = vld [vmem:[#allocation14 + $0x40] sm:$0xff]  ;;  %v1128_v38 = vld [vmem:[#allocation14 + $0x48] sm:$0xff] }
 0x125   : > { %1655 = vmatpush3.bf16.msra.mxu0 %v1654_v26  ;;  %1533 = vmatprep.mubr.msk.f32.mxu0 %vm2170_vm0, %v2171_v1  ;;  %v1119_v26 = vld [vmem:[#allocation14] sm:$0xff]  ;;  %v1129_v40 = vld [vmem:[#allocation14 + $0x50] sm:$0xff]  ;;  %v1130_v41 = vld [vmem:[#allocation14 + $0x58] sm:$0xff]  ;;  %p2084_p1 = por %p2083_p10, %p2082_p4 }
 0x126   : > { %1656 = vmatprep.subr.bf16.mxu0 %v2169_v0  ;;  %v1131_v43 = vld [vmem:[#allocation14 + $0x60] sm:$0xff]  ;;  %v1132_v44 = vld [vmem:[#allocation14 + $0x68] sm:$0xff]  ;;  %v1430_v46 = vld [vmem:[%s2820_s3] ss:$0 sm:$0xff] }
 0x127   : > { %1673 = vmatpush3.bf16.msra.mxu1 %v1672_v39  ;;  %v1720_v39 = vpack.c.bf16 %v1128_v38, %v1127_v37  ;;  %v1133_v51 = vld [vmem:[#allocation14 + $0x70] sm:$0xff]  ;;  %p2085_p13 = pnand %p2084_p1, %p2078_p2 }
 0x128   : > { %1674 = vmatprep.subr.bf16.mxu1 %v2169_v0  ;;  %v1432_v58 = vld [vmem:[%s2823_s18] ss:$0 sm:$0xff] }
 0x129   : > { %1658 = vmatpush3.bf16.msra.mxu0 %v1657_v29  ;;  %v1708_v29 = vpack.c.bf16 %v1120_v27, %v1119_v26 }
 0x12a   : > { %1683 = vmatprep.subr.bf16.mxu0 %v2169_v0 }
 0x12b   : > { %1676 = vmatpush3.bf16.msra.mxu1 %v1675_v42  ;;  %v1723_v42 = vpack.c.bf16 %v1130_v41, %v1129_v40 }
 0x12c   : > { %1534 = vmatmul.mubr.msk.f32.vlgmr.msra.gmra.mrb[4].mxu0 %vm681_vm1, %v828_v30  ;;  %1677 = vmatprep.subr.bf16.mxu1 %v2169_v0  ;;  %v1122_v30 = vld [vmem:[#allocation14 + $0x18] sm:$0xff] }
 0x12d   : > { %1603 = vmatprep.mubr.msk.f32.mxu0 %vm2170_vm0, %v2171_v1  ;;  %1685 = vmatpush3.bf16.msra.mxu0 %v1684_v52  ;;  %v1711_v31 = vpack.c.bf16 %v1122_v30, %v1121_v28  ;;  %v1134_v52 = vld [vmem:[#allocation14 + $0x78] sm:$0xff] }
 0x12e   : > { %1686 = vmatprep.subr.bf16.mxu0 %v2169_v0  ;;  %v1729_v53 = vpack.c.bf16 %v1134_v52, %v1133_v51 }
 0x12f   : > { %1679 = vmatpush3.bf16.msra.mxu1 %v1678_v45  ;;  %v1726_v45 = vpack.c.bf16 %v1132_v44, %v1131_v43 }
 0x130   : > { %1680 = vmatprep.subr.bf16.mxu1 %v2169_v0 }
 0x131   : > { %1688 = vmatpush3.bf16.msra.mxu0 %v1687_v54  ;;  %v1431_v54 = vld [vmem:[%s2821_s21] ss:$0 sm:$0xff] }
 0x132   : > { %1689 = vmatprep.subr.bf16.mxu0 %v2169_v0 }
 0x133   : > { %1682 = vmatpush3.bf16.msra.mxu1 %v1681_v48 }
 0x134   : > { %1707 = vmatprep.subr.bf16.mxu1 %v2169_v0 }
 0x135   : > { %1691 = vmatpush3.bf16.msra.mxu0 %v1690_v57 }
 0x136   : > { %1692 = vmatprep.subr.bf16.mxu0 %v2169_v0 }
 0x139   : > { %1694 = vmatpush3.bf16.msra.mxu0 %v1693_v60 }
 0x13a   : > { %1695 = vmatprep.subr.bf16.mxu0 %v2169_v0 }
 0x13d   : > { %1697 = vmatpush3.bf16.msra.mxu0 %v1696_v63 }
 0x13e   : > { %1698 = vmatprep.subr.bf16.mxu0 %v2169_v0 }
 0x141   : > { %1700 = vmatpush3.bf16.msra.mxu0 %v1699_v4 }
 0x142   : > { %1701 = vmatprep.subr.bf16.mxu0 %v2169_v0 }
 0x145   : > { %1703 = vmatpush3.bf16.msra.mxu0 %v1702_v7 }
 0x146   : > { %1704 = vmatprep.subr.bf16.mxu0 %v2169_v0 }
 0x149   : > { %1706 = vmatpush3.bf16.msra.mxu0 %v1705_v25 }
 0x199   : > { %v912_v14 = vpop.permute.xlu0 %911 }
 0x19a   : > { %v920_v15 = vmul.f32 %v1428_v13, %v912_v14 }
 0x1ef   : > { %v751_v8 = vpop.f32.mrb[0].mxu0 }
 0x1f0   : > { %v1513_v9 = vpop.f32.mrb[1].mxu0 }
 0x1f7   : > { %v824_v10 = vpop.f32.mrb[2].mxu0 }
 0x1f8   : > { %v825_v11 = vadd.f32 %v824_v10, %v751_v8  ;;  %v1524_v12 = vpop.f32.mrb[3].mxu0 }
 0x1ff   : > { %v902_v16 = vpop.f32.mrb[4].mxu0 }
 0x200   : > { %v906_v17 = vadd.f32 %v902_v16, %v825_v11  ;;  %v1535_v18 = vpop.f32.mrb[5].mxu0 }
 0x202   : > { %v921_v20 = vadd.f32 %v920_v15, %v906_v17 }
 0x204   : > { %v929_v21 = vadd.f32 %v1429_v19, %v921_v20 }
 0x206   : > { %v930_v22 = vmax.f32 %v929_v21, 0.0 }
 0x208   : > { %1569 = vmatmul.mubr.f32.vlgmr.msra.gmra.mrb[0].mxu1 %v930_v22 }
 0x209   : > { %1638 = vmatprep.mubr.msk.f32.mxu1 %vm2170_vm0, %v2171_v1  ;;  %1709 = vmatpush3.bf16.msra.mxu1 %v1708_v29  ;;  %v1125_v1 = vld [vmem:[#allocation14 + $0x30] sm:$0xff] }
 0x20a   : > { %1710 = vmatprep.subr.bf16.mxu1 %v2169_v0  ;;  %v1717_v36 = vpack.c.bf16 %v1126_v35, %v1125_v1 }
 0x20d   : > { %1712 = vmatpush3.bf16.msra.mxu1 %v1711_v31 }
 0x20e   : > { %1713 = vmatprep.subr.bf16.mxu1 %v2169_v0 }
 0x211   : > { %1715 = vmatpush3.bf16.msra.mxu1 %v1714_v34 }
 0x212   : > { %1716 = vmatprep.subr.bf16.mxu1 %v2169_v0 }
 0x215   : > { %1718 = vmatpush3.bf16.msra.mxu1 %v1717_v36 }
 0x216   : > { %1719 = vmatprep.subr.bf16.mxu1 %v2169_v0 }
 0x219   : > { %1721 = vmatpush3.bf16.msra.mxu1 %v1720_v39 }
 0x21a   : > { %1722 = vmatprep.subr.bf16.mxu1 %v2169_v0 }
 0x21d   : > { %1724 = vmatpush3.bf16.msra.mxu1 %v1723_v42 }
 0x21e   : > { %1725 = vmatprep.subr.bf16.mxu1 %v2169_v0 }
 0x221   : > { %1727 = vmatpush3.bf16.msra.mxu1 %v1726_v45 }
 0x222   : > { %1728 = vmatprep.subr.bf16.mxu1 %v2169_v0 }
 0x225   : > { %1730 = vmatpush3.bf16.msra.mxu1 %v1729_v53 }
 0x2db   : > { %v1020_v47 = vpop.f32.mrb[0].mxu1 }
 0x2dc   : > { %v1021_v48 = vadd.f32 %v1430_v46, %v1020_v47  ;;  %v1570_v49 = vpop.f32.mrb[1].mxu1 }
 0x2de   : > { %v1024_v50 = vmax.f32 %v1021_v48, 0.0 }
 0x2e0   : > { %1604 = vmatmul.mubr.f32.vlgmr.msra.gmra.mrb[6].mxu0 %v1024_v50 }
 0x3b3   : > { %v1114_v0 = vpop.f32.mrb[6].mxu0 }
 0x3b4   : > { %v1115_v55 = vadd.f32 %v1431_v54, %v1114_v0  ;;  %v1605_v56 = vpop.f32.mrb[7].mxu0 }
 0x3b6   : > { %v1118_v57 = vmax.f32 %v1115_v55, 0.0 }
 0x3b8   : > { %1639 = vmatmul.mubr.f32.vlgmr.msra.gmra.mrb[2].mxu1 %v1118_v57 }
 0x48b   : > { %v1208_v59 = vpop.f32.mrb[2].mxu1 }
 0x48c   : > { %v1209_v60 = vadd.f32 %v1432_v58, %v1208_v59  ;;  %v1640_v61 = vpop.f32.mrb[3].mxu1 }
 0x48e   : > { %1212 = vst [vmem:[%s666_s4] sm:$0xff] %v1209_v60 }
 0x48f   : > { %2088 = shalt.err (!%p2085_p13)
}
 0x490   : > { %s2089_s30 = scalar_lea.hbm %s2682_s25, 128  ;;  %s2093_s3 = scalar_lea.hbm %s2824_s8, 256 }
 0x491   : > { %p2090_p12 = scmp.ne.s32.totalorder %s2682_s25, %s2089_s30  ;;  %p2094_p9 = scmp.lt.u32.totalorder %s2682_s25, %s2824_s8 }
 0x492   : > { %p2095_p3 = scmp.lt.u32.totalorder %s2093_s3, %s2089_s30  ;;  %p2097_p6 = scmp.lt.u32.totalorder %s2089_s30, %s2682_s25 }
 0x493   : > { %p2091_p0 = pnand %p2090_p12, %p2825_p8 }
 0x494   : > { %p2096_p11 = por %p2095_p3, %p2094_p9 }
 0x495   : > { %p2092_p7 = pneg %p2091_p0 }
 0x496   : > { %p2098_p5 = por %p2097_p6, %p2096_p11 }
 0x498   : > { %p2099_p2 = pnand %p2098_p5, %p2092_p7 }
 0x49a   : > { %2102 = shalt.err (!%p2099_p2)
}
 0x49b   : > { %1757 = dma.vmem_to_hbm [thread:$0]  (%p2825_p8), %s2684_s24, 128, %s2682_s25, %s1214_s16  }
 0x49c PF: > { %s2826_s21 = sld [smem:[#allocation23_spill]]  ;;  %s2827_s5 = sld [smem:[#allocation29_spill]] }
 0x49d   : > { %s2828_s27 = sld [smem:[#allocation24_spill]] }
 0x4a2   : > { %s1239_s18 = sand.u32 1, %s2826_s21   ;;  %p2829_p4 = scmp.ne.s32.totalorder %s2827_s5, 0 }
 0x4a3   : > { %p2830_p10 = scmp.ge.s32.totalorder %s2828_s27, 2  ;;  %s1240_s7 = scalar_lea.sflag [#allocation4], %s1239_s18 }
 0x4a5   : > { %p1786_p1 = pnand %p2830_p10, %p2829_p4 }
 0x4a7   : > { %2140 = dma.done.wait (!%p1786_p1), %s1240_s7, 128  }
 0x4a8   : > { %2142 = vsyncadd (!%p1786_p1), %s1240_s7, 4294967168  ;;  %s2831_s21 = sld [smem:[#allocation26_spill]]  ;;  %s2832_s4 = sld [smem:[#allocation27_spill]] }
 0x4a9   : > { %s2833_s18 = smov %s2149_s19  ;;  %s2834_s19 = smov %s2153_s20 }
 0x4ae   : > { %p34_p13 = scmp.ge.s32.totalorder %s2831_s21, 4   ;;  %s2835_s20 = smov %s2832_s4 }
 0x4b0   :  { %36 = sbr.rel (!%p34_p13) target bundleno = 22 (0x16), region = 172 }
 0x4b7   :  { %1245 = vsyncpa [#allocation3], 1 }
 0x4b8   :  { %1247 = vsyncpa [#allocation3 + $0x1], 1 }
 0x4b9   :  { %1248 = vsyncpa [#allocation6], 1 }
 0x4ba   :  { %1250 = vsyncpa [#allocation6 + $0x1], 1 }
 0x4bb   :  { %1251 = vsyncpa [#allocation9], 1 }
 0x4bc   :  { %1252 = vsyncpa [#allocation12], 1 }
 0x4bd   :  { %1253 = vsyncpa [#allocation15], 1 }
 0x4be   :  { %1254 = vsyncpa [#allocation4], 1 }
 0x4bf   :  { %1256 = vsyncpa [#allocation4 + $0x1], 1 }

</bundles_post_ra>
